<compile_context>
chip_gen: v7x
topology: tpu7x:2x2x1
jax: 0.10.0
libtpu: 0.0.40
codegen_flags: <defaults>
</compile_context>

<pallas_src>
import math

import jax
import jax.numpy as jnp
from jax.experimental import pallas as pl
from jax.experimental.pallas import tpu as pltpu

ACTION_DIM = 105
HORIZON = 3
SIZE = 18
HIDDEN = 128
OUT_DIM = HORIZON * ACTION_DIM          # 315 (ragged)
OUT_PAD = 3 * 128                       # 384 (lane-dense padded width)


def _round_up(x, m):
    return ((x + m - 1) // m) * m


def _mlp_kernel(k_ref, w1_ref, b1_ref, wa2_ref, ba2_ref, wb2_ref, bb2_ref,
                w3_ref, b3a_ref, b3b_ref, o_ref):
    k = k_ref[...]                                   # (bn, 1) f32
    k2 = k * k                                       # (bn, 1) f32, computed once

    # ---- fused layer 1 (both branches): outer product on the VPU, f32 ----
    h1 = jnp.maximum(k * w1_ref[...] + b1_ref[...], 0.0)        # (bn, 2*HIDDEN)
    h1a = h1[:, :HIDDEN].astype(jnp.bfloat16)                   # 128-lane-aligned split
    h1b = h1[:, HIDDEN:].astype(jnp.bfloat16)

    # ---- layer 2: two 128-K MXU matmuls (portable across v5e/v6e/v7x) ----
    h2a = jnp.maximum(
        jnp.dot(h1a, wa2_ref[...], preferred_element_type=jnp.float32)
        + ba2_ref[...], 0.0)                                     # (bn, HIDDEN) f32
    h2b = jnp.maximum(
        jnp.dot(h1b, wb2_ref[...], preferred_element_type=jnp.float32)
        + bb2_ref[...], 0.0)                                     # (bn, HIDDEN) f32

    # ---- fused layer 3 (K-stacked) + combine ----
    #   a*k^2 + b == [h2a*k^2 | h2b] @ [wa3; wb3] + (ba3*k^2 + bb3)
    lhs = jnp.concatenate([h2a * k2, h2b], axis=-1).astype(jnp.bfloat16)  # (bn, 256)
    out = jnp.dot(lhs, w3_ref[...], preferred_element_type=jnp.float32)   # (bn, 384)
    out = out + b3a_ref[...] * k2 + b3b_ref[...]
    o_ref[...] = jnp.maximum(out, 0.0)               # pad cols: relu(0)=0, sliced off


def prepare_params(p):
    """Fuse / pad / cast raw (f32, pre-transposed) params into kernel layout."""
    pad = OUT_PAD - OUT_DIM
    w1 = jnp.concatenate([p["wa1"], p["wb1"]], axis=1)            # (1, 256) f32
    b1 = jnp.concatenate([p["ba1"], p["bb1"]], axis=1)            # (1, 256) f32
    w3 = jnp.concatenate([p["wa3"], p["wb3"]], axis=0)            # (256, 315)
    w3 = jnp.pad(w3, ((0, 0), (0, pad)))                          # (256, 384) zero pad
    b3a = jnp.pad(p["ba3"], ((0, 0), (0, pad)))                   # (1, 384)
    b3b = jnp.pad(p["bb3"], ((0, 0), (0, pad)))                   # (1, 384)
    return {
        "w1": w1.astype(jnp.float32), "b1": b1.astype(jnp.float32),
        "wa2": p["wa2"].astype(jnp.bfloat16), "ba2": p["ba2"].astype(jnp.float32),
        "wb2": p["wb2"].astype(jnp.bfloat16), "bb2": p["bb2"].astype(jnp.float32),
        "w3": w3.astype(jnp.bfloat16),
        "b3a": b3a.astype(jnp.float32), "b3b": b3b.astype(jnp.float32),
    }


def complex_linear_activation_net(k, prepared, *, tile_n=256):
    """k: (N,) or (N,1) f32. Returns (N, HORIZON, ACTION_DIM) f32."""
    k = jnp.asarray(k).reshape(-1, 1).astype(jnp.float32)
    n = k.shape[0]

    # Row tiling: single step at small N; blocked + pipelined at large N.
    # Row block is rounded up to a multiple of 8 so both the k block and the
    # output block are sublane-dense (unmasked loads/stores).
    bn = min(tile_n, _round_up(n, 8))
    n_pad = _round_up(n, bn)
    if n_pad != n:
        k = jnp.pad(k, ((0, n_pad - n), (0, 0)))
    grid = (n_pad // bn,)

    def row_spec(cols):
        return pl.BlockSpec((bn, cols), lambda i: (i, 0))

    def full_spec(shape):
        return pl.BlockSpec(shape, lambda i: (0, 0))   # weights stay VMEM-resident

    p = prepared
    args = (k, p["w1"], p["b1"], p["wa2"], p["ba2"], p["wb2"], p["bb2"],
            p["w3"], p["b3a"], p["b3b"])
    in_specs = [row_spec(1)] + [full_spec(a.shape) for a in args[1:]]

    out_flat = pl.pallas_call(
        _mlp_kernel,
        out_shape=jax.ShapeDtypeStruct((n_pad, OUT_PAD), jnp.float32),
        grid_spec=pltpu.PrefetchScalarGridSpec(
            num_scalar_prefetch=0,
            grid=grid,
            in_specs=in_specs,
            out_specs=row_spec(OUT_PAD),
        ),
        compiler_params=pltpu.CompilerParams(
            dimension_semantics=("parallel",)),      # shards rows across TCs on v7x
    )(*args)

    return out_flat[:n, :OUT_DIM].reshape(n, HORIZON, ACTION_DIM)


def init_params(key):
    """Deterministic params matching the PyTorch __init__ shapes/inits.

    kaiming_normal_ (fan_in, gain sqrt(2)) => std = sqrt(2 / fan_in).
    Weights stored pre-transposed as (in_dim, out_dim). Biases 0 except
    b_layer_3 bias which is 1.
    """
    keys = jax.random.split(key, 6)

    def kaiming(k_, in_dim, out_dim):
        std = math.sqrt(2.0 / in_dim)
        w = jax.random.normal(k_, (out_dim, in_dim), dtype=jnp.float32) * std
        return w.T

    return {
        "wa1": kaiming(keys[0], 1, HIDDEN),       "ba1": jnp.zeros((1, HIDDEN), jnp.float32),
        "wa2": kaiming(keys[1], HIDDEN, HIDDEN),  "ba2": jnp.zeros((1, HIDDEN), jnp.float32),
        "wa3": kaiming(keys[2], HIDDEN, OUT_DIM), "ba3": jnp.zeros((1, OUT_DIM), jnp.float32),
        "wb1": kaiming(keys[3], 1, HIDDEN),       "bb1": jnp.zeros((1, HIDDEN), jnp.float32),
        "wb2": kaiming(keys[4], HIDDEN, HIDDEN),  "bb2": jnp.zeros((1, HIDDEN), jnp.float32),
        "wb3": kaiming(keys[5], HIDDEN, OUT_DIM), "bb3": jnp.ones((1, OUT_DIM), jnp.float32),
    }


def _reference_f32(k, p):
    """Pure-JAX f32 reference of the original PyTorch forward."""
    k = k.reshape(-1, 1).astype(jnp.float32)
    relu = lambda x: jnp.maximum(x, 0.0)
    a = relu(k @ p["wa1"] + p["ba1"])
    a = relu(a @ p["wa2"] + p["ba2"])
    a = a @ p["wa3"] + p["ba3"]
    b = relu(k @ p["wb1"] + p["bb1"])
    b = relu(b @ p["wb2"] + p["bb2"])
    b = b @ p["wb3"] + p["bb3"]
    out = relu(a * k ** 2 + b)
    return out.reshape(-1, HORIZON, ACTION_DIM)


def _kernel_mirror_reference(k, p):
    """Plain-JAX mirror of the kernel's exact math / precision path."""
    k = k.reshape(-1, 1).astype(jnp.float32)
    k2 = k * k
    h1 = jnp.maximum(k * p["w1"] + p["b1"], 0.0)
    h1a = h1[:, :HIDDEN].astype(jnp.bfloat16)
    h1b = h1[:, HIDDEN:].astype(jnp.bfloat16)
    h2a = jnp.maximum(
        jnp.dot(h1a, p["wa2"], preferred_element_type=jnp.float32) + p["ba2"], 0.0)
    h2b = jnp.maximum(
        jnp.dot(h1b, p["wb2"], preferred_element_type=jnp.float32) + p["bb2"], 0.0)
    lhs = jnp.concatenate([h2a * k2, h2b], axis=-1).astype(jnp.bfloat16)
    out = jnp.dot(lhs, p["w3"], preferred_element_type=jnp.float32)
    out = jnp.maximum(out + p["b3a"] * k2 + p["b3b"], 0.0)
    return out[:, :OUT_DIM].reshape(-1, HORIZON, ACTION_DIM)


if __name__ == "__main__":
    key = jax.random.PRNGKey(0)
    params = init_params(key)
    prepared = prepare_params(params)

    # k = arange(1, SIZE + 1), as in the original script
    k_in = jnp.arange(1, SIZE + 1, dtype=jnp.float32)

    out = complex_linear_activation_net(k_in, prepared)
    out = jax.block_until_ready(out)
    assert out.shape == (SIZE, HORIZON, ACTION_DIM), out.shape

    # (1) Pallas plumbing check: kernel vs a plain-JAX mirror of its exact math.
    mirror = _kernel_mirror_reference(k_in, prepared)
    assert jnp.allclose(out, mirror, rtol=1e-3, atol=1e-1), "kernel != mirror reference"

    # (2) Semantics check vs the original f32 forward. bf16 weight storage is a
    #     deliberate perf choice, so use a global relative-error bound instead
    #     of a tight per-element tolerance.
    ref = _reference_f32(k_in, params)
    rel_err = float(jnp.max(jnp.abs(out - ref)) / (jnp.max(jnp.abs(ref)) + 1e-6))
    assert rel_err < 5e-2, f"relative error vs f32 reference too large: {rel_err}"

    print("KERNEL_OK")
</pallas_src>

<mosaic_0001>
module attributes {stable_mosaic.version = 11 : i64} {
  func.func @_mlp_kernel(%arg0: i32, %arg1: memref<24x1xf32, #tpu.memory_space<vmem>>, %arg2: memref<1x256xf32, #tpu.memory_space<vmem>>, %arg3: memref<1x256xf32, #tpu.memory_space<vmem>>, %arg4: memref<128x128xbf16, #tpu.memory_space<vmem>>, %arg5: memref<1x128xf32, #tpu.memory_space<vmem>>, %arg6: memref<128x128xbf16, #tpu.memory_space<vmem>>, %arg7: memref<1x128xf32, #tpu.memory_space<vmem>>, %arg8: memref<256x384xbf16, #tpu.memory_space<vmem>>, %arg9: memref<1x384xf32, #tpu.memory_space<vmem>>, %arg10: memref<1x384xf32, #tpu.memory_space<vmem>>, %arg11: memref<24x384xf32, #tpu.memory_space<vmem>>) attributes {dimension_semantics = [#tpu.dimension_semantics<parallel>], iteration_bounds = array<i64: 1>, scalar_prefetch = 0 : i64, scratch_operands = 0 : i64, tpu.core_type = #tpu.core_type<tc>, window_params = [{transform_indices = @transform_0, window_bounds = array<i64: 24, 1>}, {pipeline_mode = #tpu.pipeline_mode<synchronous>, transform_indices = @transform_1, window_bounds = array<i64: 1, 256>}, {pipeline_mode = #tpu.pipeline_mode<synchronous>, transform_indices = @transform_2, window_bounds = array<i64: 1, 256>}, {pipeline_mode = #tpu.pipeline_mode<synchronous>, transform_indices = @transform_3, window_bounds = array<i64: 128, 128>}, {pipeline_mode = #tpu.pipeline_mode<synchronous>, transform_indices = @transform_4, window_bounds = array<i64: 1, 128>}, {pipeline_mode = #tpu.pipeline_mode<synchronous>, transform_indices = @transform_5, window_bounds = array<i64: 128, 128>}, {pipeline_mode = #tpu.pipeline_mode<synchronous>, transform_indices = @transform_6, window_bounds = array<i64: 1, 128>}, {pipeline_mode = #tpu.pipeline_mode<synchronous>, transform_indices = @transform_7, window_bounds = array<i64: 256, 384>}, {pipeline_mode = #tpu.pipeline_mode<synchronous>, transform_indices = @transform_8, window_bounds = array<i64: 1, 384>}, {pipeline_mode = #tpu.pipeline_mode<synchronous>, transform_indices = @transform_9, window_bounds = array<i64: 1, 384>}, {transform_indices = @transform_10, window_bounds = array<i64: 24, 384>}]} {
    %c0 = arith.constant 0 : index
    %c0_0 = arith.constant 0 : index
    %0 = vector.load %arg1[%c0, %c0_0] : memref<24x1xf32, #tpu.memory_space<vmem>>, vector<24x1xf32>
    %1 = arith.mulf %0, %0 : vector<24x1xf32>
    %c0_1 = arith.constant 0 : index
    %c0_2 = arith.constant 0 : index
    %2 = vector.load %arg2[%c0_1, %c0_2] : memref<1x256xf32, #tpu.memory_space<vmem>>, vector<1x256xf32>
    %3 = vector.broadcast %0 : vector<24x1xf32> to vector<24x256xf32>
    %4 = vector.broadcast %2 : vector<1x256xf32> to vector<24x256xf32>
    %5 = arith.mulf %3, %4 : vector<24x256xf32>
    %c0_3 = arith.constant 0 : index
    %c0_4 = arith.constant 0 : index
    %6 = vector.load %arg3[%c0_3, %c0_4] : memref<1x256xf32, #tpu.memory_space<vmem>>, vector<1x256xf32>
    %7 = vector.broadcast %6 : vector<1x256xf32> to vector<24x256xf32>
    %8 = arith.addf %5, %7 : vector<24x256xf32>
    %cst = arith.constant 0.000000e+00 : f32
    %9 = vector.broadcast %cst : f32 to vector<24x256xf32>
    %10 = arith.maximumf %8, %9 : vector<24x256xf32>
    %11 = vector.extract_strided_slice %10 {offsets = [0, 0], sizes = [24, 128], strides = [1, 1]} : vector<24x256xf32> to vector<24x128xf32>
    %12 = arith.truncf %11 : vector<24x128xf32> to vector<24x128xbf16>
    %13 = vector.extract_strided_slice %10 {offsets = [0, 128], sizes = [24, 128], strides = [1, 1]} : vector<24x256xf32> to vector<24x128xf32>
    %14 = arith.truncf %13 : vector<24x128xf32> to vector<24x128xbf16>
    %c0_5 = arith.constant 0 : index
    %c0_6 = arith.constant 0 : index
    %15 = vector.load %arg4[%c0_5, %c0_6] : memref<128x128xbf16, #tpu.memory_space<vmem>>, vector<128x128xbf16>
    %cst_7 = arith.constant dense<0.000000e+00> : vector<24x128xf32>
    %16 = tpu.matmul %12, %15, %cst_7 {dimension_numbers = #tpu.dot_dimension_numbers<[1], [0], [0], [1], [0, 0, 1, 1], [], []>} : vector<24x128xbf16>, vector<128x128xbf16>, vector<24x128xf32> -> vector<24x128xf32>
    %c0_8 = arith.constant 0 : index
    %c0_9 = arith.constant 0 : index
    %17 = vector.load %arg5[%c0_8, %c0_9] : memref<1x128xf32, #tpu.memory_space<vmem>>, vector<1x128xf32>
    %18 = vector.broadcast %17 : vector<1x128xf32> to vector<24x128xf32>
    %19 = arith.addf %16, %18 : vector<24x128xf32>
    %cst_10 = arith.constant 0.000000e+00 : f32
    %20 = vector.broadcast %cst_10 : f32 to vector<24x128xf32>
    %21 = arith.maximumf %19, %20 : vector<24x128xf32>
    %c0_11 = arith.constant 0 : index
    %c0_12 = arith.constant 0 : index
    %22 = vector.load %arg6[%c0_11, %c0_12] : memref<128x128xbf16, #tpu.memory_space<vmem>>, vector<128x128xbf16>
    %cst_13 = arith.constant dense<0.000000e+00> : vector<24x128xf32>
    %23 = tpu.matmul %14, %22, %cst_13 {dimension_numbers = #tpu.dot_dimension_numbers<[1], [0], [0], [1], [0, 0, 1, 1], [], []>} : vector<24x128xbf16>, vector<128x128xbf16>, vector<24x128xf32> -> vector<24x128xf32>
    %c0_14 = arith.constant 0 : index
    %c0_15 = arith.constant 0 : index
    %24 = vector.load %arg7[%c0_14, %c0_15] : memref<1x128xf32, #tpu.memory_space<vmem>>, vector<1x128xf32>
    %25 = vector.broadcast %24 : vector<1x128xf32> to vector<24x128xf32>
    %26 = arith.addf %23, %25 : vector<24x128xf32>
    %cst_16 = arith.constant 0.000000e+00 : f32
    %27 = vector.broadcast %cst_16 : f32 to vector<24x128xf32>
    %28 = arith.maximumf %26, %27 : vector<24x128xf32>
    %29 = vector.broadcast %1 : vector<24x1xf32> to vector<24x128xf32>
    %30 = arith.mulf %21, %29 : vector<24x128xf32>
    %31 = tpu.concatenate %30, %28 in 1 : vector<24x128xf32>, vector<24x128xf32> -> vector<24x256xf32>
    %32 = arith.truncf %31 : vector<24x256xf32> to vector<24x256xbf16>
    %c0_17 = arith.constant 0 : index
    %c0_18 = arith.constant 0 : index
    %33 = vector.load %arg8[%c0_17, %c0_18] : memref<256x384xbf16, #tpu.memory_space<vmem>>, vector<256x384xbf16>
    %cst_19 = arith.constant dense<0.000000e+00> : vector<24x384xf32>
    %34 = tpu.matmul %32, %33, %cst_19 {dimension_numbers = #tpu.dot_dimension_numbers<[1], [0], [0], [1], [0, 0, 1, 1], [], []>} : vector<24x256xbf16>, vector<256x384xbf16>, vector<24x384xf32> -> vector<24x384xf32>
    %c0_20 = arith.constant 0 : index
    %c0_21 = arith.constant 0 : index
    %35 = vector.load %arg9[%c0_20, %c0_21] : memref<1x384xf32, #tpu.memory_space<vmem>>, vector<1x384xf32>
    %36 = vector.broadcast %35 : vector<1x384xf32> to vector<24x384xf32>
    %37 = vector.broadcast %1 : vector<24x1xf32> to vector<24x384xf32>
    %38 = arith.mulf %36, %37 : vector<24x384xf32>
    %39 = arith.addf %34, %38 : vector<24x384xf32>
    %c0_22 = arith.constant 0 : index
    %c0_23 = arith.constant 0 : index
    %40 = vector.load %arg10[%c0_22, %c0_23] : memref<1x384xf32, #tpu.memory_space<vmem>>, vector<1x384xf32>
    %41 = vector.broadcast %40 : vector<1x384xf32> to vector<24x384xf32>
    %42 = arith.addf %39, %41 : vector<24x384xf32>
    %cst_24 = arith.constant 0.000000e+00 : f32
    %43 = vector.broadcast %cst_24 : f32 to vector<24x384xf32>
    %44 = arith.maximumf %42, %43 : vector<24x384xf32>
    %c0_25 = arith.constant 0 : index
    %c0_26 = arith.constant 0 : index
    %45 = vector.load %arg11[%c0_25, %c0_26] : memref<24x384xf32, #tpu.memory_space<vmem>>, vector<24x384xf32>
    tpu.vector_store %arg11[%c0_25, %c0_26], %44 {strides = array<i32>} : memref<24x384xf32, #tpu.memory_space<vmem>>, vector<24x384xf32>,
    return
  }
  func.func @transform_0(%arg0: i32) -> (i32, i32) {
    %c0_i32 = arith.constant 0 : i32
    %c0_i32_0 = arith.constant 0 : i32
    return %arg0, %c0_i32 : i32, i32
  }
  func.func @transform_1(%arg0: i32) -> (i32, i32) {
    %c0_i32 = arith.constant 0 : i32
    %c0_i32_0 = arith.constant 0 : i32
    %c0_i32_1 = arith.constant 0 : i32
    return %c0_i32, %c0_i32_0 : i32, i32
  }
  func.func @transform_2(%arg0: i32) -> (i32, i32) {
    %c0_i32 = arith.constant 0 : i32
    %c0_i32_0 = arith.constant 0 : i32
    %c0_i32_1 = arith.constant 0 : i32
    return %c0_i32, %c0_i32_0 : i32, i32
  }
  func.func @transform_3(%arg0: i32) -> (i32, i32) {
    %c0_i32 = arith.constant 0 : i32
    %c0_i32_0 = arith.constant 0 : i32
    %c0_i32_1 = arith.constant 0 : i32
    return %c0_i32, %c0_i32_0 : i32, i32
  }
  func.func @transform_4(%arg0: i32) -> (i32, i32) {
    %c0_i32 = arith.constant 0 : i32
    %c0_i32_0 = arith.constant 0 : i32
    %c0_i32_1 = arith.constant 0 : i32
    return %c0_i32, %c0_i32_0 : i32, i32
  }
  func.func @transform_5(%arg0: i32) -> (i32, i32) {
    %c0_i32 = arith.constant 0 : i32
    %c0_i32_0 = arith.constant 0 : i32
    %c0_i32_1 = arith.constant 0 : i32
    return %c0_i32, %c0_i32_0 : i32, i32
  }
  func.func @transform_6(%arg0: i32) -> (i32, i32) {
    %c0_i32 = arith.constant 0 : i32
    %c0_i32_0 = arith.constant 0 : i32
    %c0_i32_1 = arith.constant 0 : i32
    return %c0_i32, %c0_i32_0 : i32, i32
  }
  func.func @transform_7(%arg0: i32) -> (i32, i32) {
    %c0_i32 = arith.constant 0 : i32
    %c0_i32_0 = arith.constant 0 : i32
    %c0_i32_1 = arith.constant 0 : i32
    return %c0_i32, %c0_i32_0 : i32, i32
  }
  func.func @transform_8(%arg0: i32) -> (i32, i32) {
    %c0_i32 = arith.constant 0 : i32
    %c0_i32_0 = arith.constant 0 : i32
    %c0_i32_1 = arith.constant 0 : i32
    return %c0_i32, %c0_i32_0 : i32, i32
  }
  func.func @transform_9(%arg0: i32) -> (i32, i32) {
    %c0_i32 = arith.constant 0 : i32
    %c0_i32_0 = arith.constant 0 : i32
    %c0_i32_1 = arith.constant 0 : i32
    return %c0_i32, %c0_i32_0 : i32, i32
  }
  func.func @transform_10(%arg0: i32) -> (i32, i32) {
    %c0_i32 = arith.constant 0 : i32
    %c0_i32_0 = arith.constant 0 : i32
    return %arg0, %c0_i32 : i32, i32
  }
}

</mosaic_0001>

<bundles_post_ra>
// kernel: tpu_custom_call.1
= control target key start
LH: loop header
LB: loop body
LE: loop exit
PB: predicated region body
PF: predicated region fallthrough
CT: control target
= control target key end

     0   :  { %15 = vsyncpa [#allocation3], 0  ;;  %s1424_s0 = inlined_call_operand.vmem [shape: f32[24,1], index: 0, kind: input, shape index: {}]   ;;  %s1425_s1 = inlined_call_operand.vmem [shape: f32[1,256], index: 1, kind: input, shape index: {}]   ;;  %s1426_s2 = inlined_call_operand.vmem [shape: f32[1,256], index: 2, kind: input, shape index: {}]   ;;  %s1427_s3 = inlined_call_operand.hbm [shape: bf16[128,128], index: 3, kind: input, shape index: {}]   ;;  %s1428_s4 = inlined_call_operand.vmem [shape: f32[1,128], index: 4, kind: input, shape index: {}]   ;;  %s1429_s5 = inlined_call_operand.hbm [shape: bf16[128,128], index: 5, kind: input, shape index: {}]   ;;  %s1430_s6 = inlined_call_operand.vmem [shape: f32[1,128], index: 6, kind: input, shape index: {}]   ;;  %s1431_s7 = inlined_call_operand.hbm [shape: bf16[256,384], index: 7, kind: input, shape index: {}]   ;;  %s1432_s8 = inlined_call_operand.vmem [shape: f32[1,384], index: 8, kind: input, shape index: {}]   ;;  %s1433_s9 = inlined_call_operand.vmem [shape: f32[1,384], index: 9, kind: input, shape index: {}]   ;;  %s1434_s10 = inlined_call_operand.hbm [shape: f32[24,384], index: 10, kind: output, shape index: {}]  }
   0x1   :  { %16 = vsyncpa [#allocation6], 0 }
   0x2   :  { %17 = vsyncpa [#allocation4], 0  ;;  %s1259_s13 = smov [#allocation5]   ;;  %s1260_s15 = smov [#allocation2]  }
   0x3   :  { %s43_s14 = sshll.u32 %s1259_s13, 4  ;;  %s29_s16 = sshll.u32 %s1260_s15, 4  ;;  %s44_s14 = int_to_ptr.vmem [resolvable:$true] %s43_s14  ;;  %s1325_s16 = int_to_ptr.vmem [resolvable:$true] %s29_s16 }
   0x4   :  { %s1165_s19 = scalar_lea.hbm %s1429_s5, 1024 }
   0x5   :  { %p1166_p0 = scmp.ne.s32.totalorder %s1429_s5, %s1165_s19  ;;  %p1169_p1 = scmp.lt.u32.totalorder %s1165_s19, %s1429_s5 }
   0x7   :  { %p1171_p2 = pnand %p1169_p1, %p1166_p0 }
   0x9   :  { %1174 = shalt.err (!%p1171_p2)
}
   0xa   :  { %s1175_s24 = scalar_lea.vmem %s44_s14, 1024  ;;  %p1180_p4 = scmp.lt.s32.totalorder %s44_s14, %s44_s14 }
   0xb   :  { %p1176_p3 = scmp.ne.s32.totalorder %s44_s14, %s1175_s24  ;;  %p1181_p5 = scmp.lt.s32.totalorder %s1175_s24, %s1175_s24 }
   0xd   :  { %p1182_p6 = por %p1181_p5, %p1180_p4 }
   0xf   :  { %p1183_p7 = pnand %p1182_p6, %p1176_p3 }
  0x11   :  { %1186 = shalt.err (!%p1183_p7)
}
  0x12   :  { %s1261_s25 = smov 64   ;;  %s1262_s26 = smov 4  }
  0x13   :  { %49 = dma.hbm_to_vmem [thread:$0]  %s1429_s5, 1024, %s44_s14, [#allocation6], %s1261_s25, %s1261_s25, %s1262_s26  }
  0x14   :  { %s1187_s11 = scalar_lea.hbm %s1427_s3, 1024 }
  0x15   :  { %p1188_p8 = scmp.ne.s32.totalorder %s1427_s3, %s1187_s11  ;;  %p1191_p9 = scmp.lt.u32.totalorder %s1187_s11, %s1427_s3 }
  0x17   :  { %p1193_p10 = pnand %p1191_p9, %p1188_p8 }
  0x19   :  { %1196 = shalt.err (!%p1193_p10)
}
  0x1a   :  { %s1197_s18 = scalar_lea.vmem %s1325_s16, 1024  ;;  %p1202_p12 = scmp.lt.s32.totalorder %s1325_s16, %s1325_s16 }
  0x1b   :  { %p1198_p11 = scmp.ne.s32.totalorder %s1325_s16, %s1197_s18  ;;  %p1203_p13 = scmp.lt.s32.totalorder %s1197_s18, %s1197_s18 }
  0x1d   :  { %p1204_p0 = por %p1203_p13, %p1202_p12 }
  0x1f   :  { %p1205_p1 = pnand %p1204_p0, %p1198_p11 }
  0x21   :  { %1208 = shalt.err (!%p1205_p1)
}
  0x22   :  { %35 = dma.hbm_to_vmem [thread:$0]  %s1427_s3, 1024, %s1325_s16, [#allocation3], %s1261_s25, %s1261_s25, %s1262_s26  }
  0x23   :  { %s1263_s19 = smov [#allocation7]   ;;  %s1209_s23 = scalar_lea.hbm %s1431_s7, 6144 }
  0x24   :  { %s57_s20 = sshll.u32 %s1263_s19, 4  ;;  %p1210_p2 = scmp.ne.s32.totalorder %s1431_s7, %s1209_s23  ;;  %s58_s20 = int_to_ptr.vmem [resolvable:$true] %s57_s20 }
  0x25   :  { %p1213_p3 = scmp.lt.u32.totalorder %s1209_s23, %s1431_s7 }
  0x27   :  { %p1215_p4 = pnand %p1213_p3, %p1210_p2 }
  0x29   :  { %1218 = shalt.err (!%p1215_p4)
}
  0x2a   :  { %s1219_s30 = scalar_lea.vmem %s58_s20, 6144  ;;  %p1224_p6 = scmp.lt.s32.totalorder %s58_s20, %s58_s20 }
  0x2b   :  { %p1220_p5 = scmp.ne.s32.totalorder %s58_s20, %s1219_s30  ;;  %p1225_p7 = scmp.lt.s32.totalorder %s1219_s30, %s1219_s30 }
  0x2d   :  { %p1226_p8 = por %p1225_p7, %p1224_p6 }
  0x2f   :  { %p1227_p9 = pnand %p1226_p8, %p1220_p5 }
  0x31   :  { %1230 = shalt.err (!%p1227_p9)
}
  0x32   :  { %s1264_s3 = smov 192   ;;  %s1265_s16 = smov 12  }
  0x33   :  { %63 = dma.hbm_to_vmem [thread:$0]  %s1431_s7, 6144, %s58_s20, [#allocation6], %s1264_s3, %s1264_s3, %s1265_s16  }
  0x34   :  { %1253 = dma.done.wait [#allocation3], 1024  }
  0x35   :  { %1254 = vsyncadd [#allocation3], 4294966272 }
  0x36   :  { %1255 = dma.done.wait [#allocation6], 7168  }
  0x37   :  { %1256 = vsyncadd [#allocation6], 4294960128  ;;  %v1266_v0 = vmov 0   ;;  %v80_v1 = vld [vmem:[%s1424_s0 + $0x10] sm:$0xff]  ;;  %v78_v2 = vld [vmem:[%s1424_s0] sm:$0xff]  ;;  %v101_v25 = vlaneseq }
  0x38   :  { %1084 = vset.pattern.permute.xlu1 %v1266_v0  ;;  %1083 = vset.pattern.permute.xlu0 %v1266_v0  ;;  %v79_v3 = vld [vmem:[%s1424_s0 + $0x8] sm:$0xff]  ;;  %v81_v4 = vmul.f32 %v78_v2, %v78_v2  ;;  %v1087_v7 = vld [vmem:[#allocation2 + $0x8] sm:$0xff]   ;;  %v83_v9 = vmul.f32 %v80_v1, %v80_v1  ;;  %v1089_v11 = vld [vmem:[#allocation2 + $0x10] sm:$0xff]  }
  0x39   :  { %97 = vperm.xlu1 %1084, %v80_v1   ;;  %87 = vperm.xlu0 %1083, %v78_v2   ;;  %v1085_v5 = vld [vmem:[#allocation2] sm:$0xff]   ;;  %v1088_v8 = vld [vmem:[#allocation5 + $0x8] sm:$0xff]   ;;  %v82_v10 = vmul.f32 %v79_v3, %v79_v3  ;;  %v1090_v12 = vld [vmem:[#allocation5 + $0x10] sm:$0xff]   ;;  %v1377_v26 = vshrl.u32 %v101_v25, 7 }
  0x3a   :  { %v1086_v6 = vld [vmem:[#allocation5] sm:$0xff]   ;;  %1032 = vmatprep.subr.bf16.mxu0 %v1085_v5  ;;  %v1091_v13 = vld [vmem:[#allocation2 + $0x18] sm:$0xff]   ;;  %v1095_v17 = vld [vmem:[#allocation2 + $0x28] sm:$0xff]  }
  0x3b   :  { %1052 = vmatprep.subr.bf16.mxu1 %v1086_v6  ;;  %1033 = vmatpush3.bf16.msra.mxu0 %v1085_v5  ;;  %v1092_v14 = vld [vmem:[#allocation5 + $0x18] sm:$0xff]   ;;  %v1093_v15 = vld [vmem:[#allocation2 + $0x20] sm:$0xff]   ;;  %v1096_v18 = vld [vmem:[#allocation5 + $0x28] sm:$0xff]   ;;  %v1380_v27 = vsub.s32 0, %v1377_v26  ;;  %v1383_v28 = vsub.s32 1, %v1377_v26 }
  0x3c   :  { %1053 = vmatpush3.bf16.msra.mxu1 %v1086_v6  ;;  %1034 = vmatprep.subr.bf16.mxu0 %v1087_v7  ;;  %v1094_v16 = vld [vmem:[#allocation5 + $0x20] sm:$0xff]   ;;  %v1097_v19 = vld [vmem:[#allocation2 + $0x30] sm:$0xff]   ;;  %v1099_v21 = vld [vmem:[#allocation2 + $0x38] sm:$0xff]  }
  0x3d   :  { %92 = vperm.xlu0 %1083, %v79_v3   ;;  %391 = vperm.xlu1 %1084, %v81_v4   ;;  %v1098_v20 = vld [vmem:[#allocation5 + $0x30] sm:$0xff]   ;;  %v1100_v22 = vld [vmem:[#allocation5 + $0x38] sm:$0xff]   ;;  %v1101_v60 = vld [vmem:[#allocation7] ss:$12 sps:$4 sm:$0xff]  }
  0x3e   :  { %1054 = vmatprep.subr.bf16.mxu1 %v1088_v8  ;;  %v1103_v23 = vld [vmem:[#allocation7 + $0x4] ss:$12 sps:$4 sm:$0xff]   ;;  %v1128_v24 = vld [vmem:[#allocation7 + $0xc8] ss:$12 sps:$4 sm:$0xff]   ;;  %v84_v29 = vld [vmem:[%s1425_s1] sm:$0x3] }
  0x3f   :  { %1035 = vmatpush3.bf16.msra.mxu0 %v1087_v7  ;;  %v104_v30 = vrot.slane %v84_v29, %v1380_v27  ;;  %v108_v31 = vrot.slane %v84_v29, %v1383_v28  ;;  %v117_v32 = vld [vmem:[%s1426_s2] sm:$0x3]  ;;  %v1129_v61 = vld [vmem:[#allocation7 + $0x8] ss:$12 sps:$4 sm:$0xff]   ;;  %v1133_v63 = vld [vmem:[#allocation7 + $0xe0] ss:$12 sps:$4 sm:$0xff]  }
  0x40   :  { %1055 = vmatpush3.bf16.msra.mxu1 %v1088_v8  ;;  %1036 = vmatprep.subr.bf16.mxu0 %v1089_v11  ;;  %v122_v33 = vrot.slane %v117_v32, %v1380_v27  ;;  %v126_v34 = vrot.slane %v117_v32, %v1383_v28  ;;  %v1106_v62 = vld [vmem:[#allocation7 + $0x1c] ss:$12 sps:$4 sm:$0xff]   ;;  %v1104_v0 = vld [vmem:[#allocation7 + $0x18] ss:$12 sps:$4 sm:$0xff]   ;;  %v1134_v1 = vld [vmem:[#allocation7 + $0x20] ss:$12 sps:$4 sm:$0xff]  }
  0x41   :  { %396 = vperm.xlu0 %1083, %v82_v10   ;;  %401 = vperm.xlu1 %1084, %v83_v9   ;;  %v1109_v2 = vld [vmem:[#allocation7 + $0x34] ss:$12 sps:$4 sm:$0xff]   ;;  %v1138_v3 = vld [vmem:[#allocation7 + $0xf8] ss:$12 sps:$4 sm:$0xff]   ;;  %v1107_v4 = vld [vmem:[#allocation7 + $0x30] ss:$12 sps:$4 sm:$0xff]  }
  0x42   :  { %1056 = vmatprep.subr.bf16.mxu1 %v1090_v12  ;;  %v1139_v5 = vld [vmem:[#allocation7 + $0x38] ss:$12 sps:$4 sm:$0xff]   ;;  %v1143_v7 = vld [vmem:[#allocation7 + $0x110] ss:$12 sps:$4 sm:$0xff]   ;;  %v1110_v8 = vld [vmem:[#allocation7 + $0x48] ss:$12 sps:$4 sm:$0xff]  }
  0x43   :  { %1037 = vmatpush3.bf16.msra.mxu0 %v1089_v11  ;;  %v1112_v6 = vld [vmem:[#allocation7 + $0x4c] ss:$12 sps:$4 sm:$0xff]   ;;  %v1144_v9 = vld [vmem:[#allocation7 + $0x50] ss:$12 sps:$4 sm:$0xff]   ;;  %v1148_v11 = vld [vmem:[#allocation7 + $0x128] ss:$12 sps:$4 sm:$0xff]  }
  0x44   :  { %1038 = vmatprep.subr.bf16.mxu0 %v1091_v13  ;;  %1057 = vmatpush3.bf16.msra.mxu1 %v1090_v12  ;;  %v1115_v10 = vld [vmem:[#allocation7 + $0x64] ss:$12 sps:$4 sm:$0xff]   ;;  %v1113_v12 = vld [vmem:[#allocation7 + $0x60] ss:$12 sps:$4 sm:$0xff]  }
  0x45   :  { %1058 = vmatprep.subr.bf16.mxu1 %v1092_v14  ;;  %v1135_v25 = vld [vmem:[#allocation7 + $0xf0] ss:$12 sps:$4 sm:$0xff]   ;;  %v1142_v29 = vld [vmem:[#allocation7 + $0x10c] ss:$12 sps:$4 sm:$0xff]  }
  0x46   :  { %v1145_v32 = vld [vmem:[#allocation7 + $0x120] ss:$12 sps:$4 sm:$0xff]  }
  0x47   :  { %1039 = vmatpush3.bf16.msra.mxu0 %v1091_v13  ;;  %v1149_v13 = vld [vmem:[#allocation7 + $0x68] ss:$12 sps:$4 sm:$0xff]  }
  0x48   :  { %1040 = vmatprep.subr.bf16.mxu0 %v1093_v15  ;;  %1059 = vmatpush3.bf16.msra.mxu1 %v1092_v14  ;;  %v1118_v14 = vld [vmem:[#allocation7 + $0x7c] ss:$12 sps:$4 sm:$0xff]  }
  0x49   :  { %1060 = vmatprep.subr.bf16.mxu1 %v1094_v16 }
  0x4b   :  { %1041 = vmatpush3.bf16.msra.mxu0 %v1093_v15  ;;  %v1116_v15 = vld [vmem:[#allocation7 + $0x78] ss:$12 sps:$4 sm:$0xff]  }
  0x4c   :  { %1042 = vmatprep.subr.bf16.mxu0 %v1095_v17  ;;  %1061 = vmatpush3.bf16.msra.mxu1 %v1094_v16  ;;  %v1121_v16 = vld [vmem:[#allocation7 + $0x94] ss:$12 sps:$4 sm:$0xff]  }
  0x4d   :  { %1062 = vmatprep.subr.bf16.mxu1 %v1096_v18 }
  0x4f   :  { %1043 = vmatpush3.bf16.msra.mxu0 %v1095_v17  ;;  %v1119_v17 = vld [vmem:[#allocation7 + $0x90] ss:$12 sps:$4 sm:$0xff]  }
  0x50   :  { %1044 = vmatprep.subr.bf16.mxu0 %v1097_v19  ;;  %1063 = vmatpush3.bf16.msra.mxu1 %v1096_v18  ;;  %v1124_v18 = vld [vmem:[#allocation7 + $0xac] ss:$12 sps:$4 sm:$0xff]  }
  0x51   :  { %1064 = vmatprep.subr.bf16.mxu1 %v1098_v20 }
  0x53   :  { %1045 = vmatpush3.bf16.msra.mxu0 %v1097_v19  ;;  %v1122_v19 = vld [vmem:[#allocation7 + $0xa8] ss:$12 sps:$4 sm:$0xff]  }
  0x54   :  { %1046 = vmatprep.subr.bf16.mxu0 %v1099_v21  ;;  %1065 = vmatpush3.bf16.msra.mxu1 %v1098_v20  ;;  %v1127_v20 = vld [vmem:[#allocation7 + $0xc4] ss:$12 sps:$4 sm:$0xff]  }
  0x55   :  { %1066 = vmatprep.subr.bf16.mxu1 %v1100_v22 }
  0x57   :  { %1047 = vmatpush3.bf16.msra.mxu0 %v1099_v21  ;;  %v1125_v21 = vld [vmem:[#allocation7 + $0xc0] ss:$12 sps:$4 sm:$0xff]  }
  0x58   :  { %757 = vmatprep.subr.bf16.mxu0 %v1103_v23  ;;  %1067 = vmatpush3.bf16.msra.mxu1 %v1100_v22  ;;  %v1132_v22 = vld [vmem:[#allocation7 + $0xdc] ss:$12 sps:$4 sm:$0xff]   ;;  %v1130_v23 = vld [vmem:[#allocation7 + $0xd8] ss:$12 sps:$4 sm:$0xff]  }
  0x59   :  { %1004 = vmatprep.subr.bf16.mxu1 %v1128_v24  ;;  %v1137_v24 = vld [vmem:[#allocation7 + $0xf4] ss:$12 sps:$4 sm:$0xff]  }
  0xb8   :  { %v98_v35 = vpop.permute.xlu1 %97  ;;  %v88_v36 = vpop.permute.xlu0 %87 }
  0xb9   :  { %v115_v37 = vmul.f32 %v104_v30, %v98_v35  ;;  %v116_v38 = vmul.f32 %v108_v31, %v98_v35  ;;  %v111_v39 = vmul.f32 %v104_v30, %v88_v36  ;;  %v112_v40 = vmul.f32 %v108_v31, %v88_v36  ;;  %v1150_v35 = vld [vmem:[#allocation7 + $0x138] ss:$12 sps:$4 sm:$0xff]   ;;  %v1154_v36 = vld [vmem:[#allocation7 + $0x80] ss:$12 sps:$4 sm:$0xff]  }
  0xbb   :  { %v133_v41 = vadd.f32 %v122_v33, %v115_v37  ;;  %v134_v42 = vadd.f32 %v126_v34, %v116_v38  ;;  %v129_v46 = vadd.f32 %v122_v33, %v111_v39  ;;  %v130_v47 = vadd.f32 %v126_v34, %v112_v40  ;;  %v1157_v37 = vld [vmem:[#allocation7 + $0x154] ss:$12 sps:$4 sm:$0xff]   ;;  %v1158_v38 = vld [vmem:[#allocation7 + $0x158] ss:$12 sps:$4 sm:$0xff]   ;;  %v1155_v39 = vld [vmem:[#allocation7 + $0x150] ss:$12 sps:$4 sm:$0xff]  }
  0xbc   :  { %v93_v43 = vpop.permute.xlu0 %92  ;;  %v1159_v40 = vld [vmem:[#allocation7 + $0x98] ss:$12 sps:$4 sm:$0xff]  }
  0xbd   :  { %v113_v44 = vmul.f32 %v104_v30, %v93_v43  ;;  %v114_v45 = vmul.f32 %v108_v31, %v93_v43  ;;  %v139_v48 = vmax.f32 %v133_v41, 0.0  ;;  %v140_v49 = vmax.f32 %v134_v42, 0.0  ;;  %v1140_v30 = vld [vmem:[#allocation7 + $0x108] ss:$12 sps:$4 sm:$0xff]   ;;  %v1147_v31 = vld [vmem:[#allocation7 + $0x124] ss:$12 sps:$4 sm:$0xff]  }
  0xbe   :  { %v135_v52 = vmax.f32 %v129_v46, 0.0  ;;  %v136_v54 = vmax.f32 %v130_v47, 0.0  ;;  %v1162_v41 = vld [vmem:[#allocation7 + $0x16c] ss:$12 sps:$4 sm:$0xff]   ;;  %v1163_v42 = vld [vmem:[#allocation7 + $0x170] ss:$12 sps:$4 sm:$0xff]  }
  0xbf   :  { %v131_v50 = vadd.f32 %v122_v33, %v113_v44  ;;  %v132_v51 = vadd.f32 %v126_v34, %v114_v45  ;;  %v142_v56 = vpack.c.bf16 %v139_v48, %v139_v48  ;;  %v144_v57 = vpack.c.bf16 %v140_v49, %v140_v49  ;;  %v1152_v33 = vld [vmem:[#allocation7 + $0x13c] ss:$12 sps:$4 sm:$0xff]   ;;  %v1153_v34 = vld [vmem:[#allocation7 + $0x140] ss:$12 sps:$4 sm:$0xff]   ;;  %v918_v45 = vld [vmem:[%s1428_s4] ss:$0 sm:$0xff] }
  0xc0   :  { %v1160_v43 = vld [vmem:[#allocation7 + $0x168] ss:$12 sps:$4 sm:$0xff]   ;;  %v1164_v44 = vld [vmem:[#allocation7 + $0xb0] ss:$12 sps:$4 sm:$0xff]   ;;  %v927_v46 = vld [vmem:[%s1430_s6] ss:$0 sm:$0xff] }
  0xc1   :  { %v137_v53 = vmax.f32 %v131_v50, 0.0  ;;  %v138_v55 = vmax.f32 %v132_v51, 0.0 }
  0xc3   :  { %v141_v58 = vpack.c.bf16 %v137_v53, %v135_v52  ;;  %v143_v59 = vpack.c.bf16 %v138_v55, %v136_v54 }
  0xc5   :  { %1048 = vmatprep.mubr.bf16.mxu0 %v141_v58  ;;  %1068 = vmatprep.mubr.bf16.mxu1 %v143_v59 }
  0xc6   :  { %1049 = vmatmul.mubr.bf16.vlgmr.msra.gmra.mrb[0].mxu0 %v142_v56  ;;  %1069 = vmatmul.mubr.bf16.vlgmr.msra.gmra.mrb[0].mxu1 %v144_v57 }
  0xc7   :  { %758 = vmatpush1.bf16.msra.mxu0 %v1101_v60  ;;  %1005 = vmatpush3.bf16.msra.mxu1 %v1129_v61 }
  0xc8   :  { %759 = vmatprep.subr.bf16.mxu0 %v1106_v62  ;;  %1006 = vmatprep.subr.bf16.mxu1 %v1133_v63 }
  0xcb   :  { %760 = vmatpush1.bf16.msra.mxu0 %v1104_v0  ;;  %1007 = vmatpush3.bf16.msra.mxu1 %v1134_v1  ;;  %v392_v1 = vpop.permute.xlu1 %391 }
  0xcc   :  { %761 = vmatprep.subr.bf16.mxu0 %v1109_v2  ;;  %1008 = vmatprep.subr.bf16.mxu1 %v1138_v3  ;;  %v397_v2 = vpop.permute.xlu0 %396 }
  0xcf   :  { %762 = vmatpush1.bf16.msra.mxu0 %v1107_v4  ;;  %1009 = vmatpush3.bf16.msra.mxu1 %v1139_v5 }
  0xd0   :  { %763 = vmatprep.subr.bf16.mxu0 %v1112_v6  ;;  %1010 = vmatprep.subr.bf16.mxu1 %v1143_v7 }
  0xd3   :  { %764 = vmatpush1.bf16.msra.mxu0 %v1110_v8  ;;  %1011 = vmatpush3.bf16.msra.mxu1 %v1144_v9 }
  0xd4   :  { %765 = vmatprep.subr.bf16.mxu0 %v1115_v10  ;;  %1012 = vmatprep.subr.bf16.mxu1 %v1148_v11  ;;  %v402_v10 = vpop.permute.xlu1 %401 }
  0xd7   :  { %766 = vmatpush1.bf16.msra.mxu0 %v1113_v12  ;;  %1013 = vmatpush3.bf16.msra.mxu1 %v1149_v13  ;;  %v475_v13 = vld [vmem:[%s1432_s8] sm:$0x7]  ;;  %s1267_s8 = smov [#allocation8]  }
  0xd8   :  { %767 = vmatprep.subr.bf16.mxu0 %v1118_v14  ;;  %1014 = vmatprep.subr.bf16.mxu1 %v1153_v34  ;;  %v487_v14 = vsub.s32 2, %v1377_v26 }
  0xdb   :  { %768 = vmatpush1.bf16.msra.mxu0 %v1116_v15  ;;  %1015 = vmatpush3.bf16.msra.mxu1 %v1154_v36  ;;  %v480_v15 = vrot.slane %v475_v13, %v1380_v27 }
  0xdc   :  { %769 = vmatprep.subr.bf16.mxu0 %v1121_v16  ;;  %1016 = vmatprep.subr.bf16.mxu1 %v1158_v38  ;;  %v856_v16 = vld [vmem:[%s1433_s9] sm:$0x7]  ;;  %s905_s9 = sshll.u32 %s1267_s8, 4  ;;  %s906_s9 = int_to_ptr.vmem [resolvable:$true] %s905_s9 }
  0xdd   :  { %v869_v34 = vrot.slane %v856_v16, %v487_v14  ;;  %s1231_s23 = scalar_lea.vmem %s906_s9, 1152  ;;  %p1236_p11 = scmp.lt.s32.totalorder %s906_s9, %s906_s9 }
  0xde   :  { %p1232_p10 = scmp.ne.s32.totalorder %s906_s9, %s1231_s23  ;;  %p1237_p12 = scmp.lt.s32.totalorder %s1231_s23, %s1231_s23 }
  0xdf   :  { %770 = vmatpush1.bf16.msra.mxu0 %v1119_v17  ;;  %1017 = vmatpush3.bf16.msra.mxu1 %v1159_v40  ;;  %v484_v17 = vrot.slane %v475_v13, %v1383_v28 }
  0xe0   :  { %771 = vmatprep.subr.bf16.mxu0 %v1124_v18  ;;  %1018 = vmatprep.subr.bf16.mxu1 %v1163_v42  ;;  %v488_v18 = vrot.slane %v475_v13, %v487_v14  ;;  %p1238_p13 = por %p1237_p12, %p1236_p11 }
  0xe2   :  { %v494_v26 = vmul.f32 %v488_v18, %v392_v1  ;;  %v497_v38 = vmul.f32 %v488_v18, %v397_v2  ;;  %p1239_p0 = pnand %p1238_p13, %p1232_p10 }
  0xe3   :  { %772 = vmatpush1.bf16.msra.mxu0 %v1122_v19  ;;  %1019 = vmatpush3.bf16.msra.mxu1 %v1164_v44  ;;  %v492_v19 = vmul.f32 %v480_v15, %v392_v1 }
  0xe4   :  { %773 = vmatprep.subr.bf16.mxu0 %v1127_v20  ;;  %v861_v20 = vrot.slane %v856_v16, %v1380_v27 }
  0xe7   :  { %774 = vmatpush1.bf16.msra.mxu0 %v1125_v21 }
  0xe8   :  { %775 = vmatprep.subr.bf16.mxu0 %v1132_v22 }
  0xeb   :  { %776 = vmatpush1.bf16.msra.mxu0 %v1130_v23  ;;  %v493_v23 = vmul.f32 %v484_v17, %v392_v1 }
  0xec   :  { %777 = vmatprep.subr.bf16.mxu0 %v1137_v24  ;;  %v865_v24 = vrot.slane %v856_v16, %v1383_v28 }
  0xef   :  { %778 = vmatpush1.bf16.msra.mxu0 %v1135_v25 }
  0xf0   :  { %779 = vmatprep.subr.bf16.mxu0 %v1142_v29 }
  0xf3   :  { %780 = vmatpush1.bf16.msra.mxu0 %v1140_v30 }
  0xf4   :  { %781 = vmatprep.subr.bf16.mxu0 %v1147_v31  ;;  %v495_v31 = vmul.f32 %v480_v15, %v397_v2 }
  0xf7   :  { %782 = vmatpush1.bf16.msra.mxu0 %v1145_v32 }
  0xf8   :  { %783 = vmatprep.subr.bf16.mxu0 %v1152_v33 }
  0xfb   :  { %784 = vmatpush1.bf16.msra.mxu0 %v1150_v35 }
  0xfc   :  { %785 = vmatprep.subr.bf16.mxu0 %v1157_v37  ;;  %v496_v37 = vmul.f32 %v484_v17, %v397_v2 }
  0xff   :  { %786 = vmatpush1.bf16.msra.mxu0 %v1155_v39 }
 0x100   :  { %787 = vmatprep.subr.bf16.mxu0 %v1162_v41 }
 0x103   :  { %788 = vmatpush1.bf16.msra.mxu0 %v1160_v43 }
 0x199   :  { %v1050_v47 = vpop.f32.mrb[0].mxu0  ;;  %v1070_v48 = vpop.f32.mrb[0].mxu1 }
 0x19a   :  { %v250_v49 = vpop.f32.mrb[1].mxu0  ;;  %v372_v50 = vpop.f32.mrb[1].mxu1  ;;  %v381_v55 = vadd.f32 %v1070_v48, %v927_v46  ;;  %v259_v61 = vadd.f32 %v1050_v47, %v918_v45 }
 0x19b   :  { %v251_v51 = vadd.f32 %v918_v45, %v250_v49  ;;  %v373_v52 = vadd.f32 %v927_v46, %v372_v50  ;;  %v1051_v53 = vpop.f32.mrb[2].mxu0  ;;  %v1071_v54 = vpop.f32.mrb[2].mxu1 }
 0x19c   :  { %v253_v56 = vpop.f32.mrb[3].mxu0  ;;  %v375_v57 = vpop.f32.mrb[3].mxu1  ;;  %v388_v3 = vmax.f32 %v381_v55, 0.0  ;;  %v266_v7 = vmax.f32 %v259_v61, 0.0 }
 0x19d   :  { %v264_v58 = vmax.f32 %v251_v51, 0.0  ;;  %v254_v59 = vadd.f32 %v918_v45, %v253_v56  ;;  %v376_v60 = vadd.f32 %v927_v46, %v375_v57  ;;  %v386_v62 = vmax.f32 %v373_v52, 0.0 }
 0x19e   :  { %v410_v9 = vpack.c.bf16 %v388_v3, %v388_v3  ;;  %v406_v11 = vmul.f32 %v402_v10, %v266_v7  ;;  %v498_v52 = vmul.f32 %v480_v15, %v402_v10 }
 0x19f   :  { %v265_v63 = vmax.f32 %v254_v59, 0.0  ;;  %v387_v0 = vmax.f32 %v376_v60, 0.0  ;;  %v404_v4 = vmul.f32 %v392_v1, %v264_v58  ;;  %v499_v58 = vmul.f32 %v484_v17, %v402_v10 }
 0x1a0   :  { %v409_v12 = vpack.c.bf16 %v406_v11, %v406_v11 }
 0x1a1   :  { %v405_v5 = vmul.f32 %v397_v2, %v265_v63  ;;  %v408_v6 = vpack.c.bf16 %v387_v0, %v386_v62  ;;  %v500_v62 = vmul.f32 %v488_v18, %v402_v10 }
 0x1a3   :  { %v407_v8 = vpack.c.bf16 %v405_v5, %v404_v4  ;;  %789 = vmatprep.mubr.bf16.mxu0 %v408_v6  ;;  %840 = vmatprep.mubr.bf16.mxu1 %v408_v6 }
 0x1a5   :  { %790 = vmatmul.mubr.bf16.vlgmr.msra.gmra.mrb[4].mxu0 %v407_v8  ;;  %841 = vmatmul.mubr.bf16.vlgmr.msra.gmra.mrb[4].mxu1 %v407_v8 }
 0x1a6   :  { %799 = vmatprep.mubr.bf16.mxu0 %v410_v9  ;;  %848 = vmatprep.mubr.bf16.mxu1 %v410_v9 }
 0x1ad   :  { %800 = vmatmul.mubr.bf16.gmra.mrb[8].mxu0 %v409_v12  ;;  %849 = vmatmul.mubr.bf16.gmra.mrb[8].mxu1 %v409_v12 }
 0x278   :  { %v791_v21 = vpop.f32.mrb[4].mxu0  ;;  %v1020_v22 = vpop.f32.mrb[4].mxu1 }
 0x279   :  { %v792_v25 = vadd.f32 %v791_v21, %v492_v19  ;;  %v793_v29 = vpop.f32.mrb[5].mxu0  ;;  %v1021_v30 = vpop.f32.mrb[5].mxu1 }
 0x27a   :  { %v794_v32 = vadd.f32 %v793_v29, %v493_v23  ;;  %v1022_v33 = vadd.f32 %v1021_v30, %v1020_v22  ;;  %v795_v35 = vpop.f32.mrb[6].mxu0  ;;  %v1023_v36 = vpop.f32.mrb[6].mxu1 }
 0x27b   :  { %v873_v39 = vadd.f32 %v861_v20, %v792_v25  ;;  %v796_v40 = vadd.f32 %v795_v35, %v495_v31  ;;  %v797_v27 = vpop.f32.mrb[7].mxu0  ;;  %v1024_v41 = vpop.f32.mrb[7].mxu1 }
 0x27c   :  { %v874_v42 = vadd.f32 %v865_v24, %v794_v32  ;;  %v843_v43 = vadd.f32 %v1022_v33, %v494_v26  ;;  %v798_v44 = vadd.f32 %v797_v27, %v496_v37  ;;  %v1025_v28 = vadd.f32 %v1024_v41, %v1023_v36 }
 0x27d   :  { %v882_v45 = vmax.f32 %v873_v39, 0.0  ;;  %v876_v46 = vadd.f32 %v861_v20, %v796_v40 }
 0x27e   :  { %v883_v47 = vmax.f32 %v874_v42, 0.0  ;;  %v875_v48 = vadd.f32 %v869_v34, %v843_v43  ;;  %v877_v49 = vadd.f32 %v865_v24, %v798_v44  ;;  %v846_v50 = vadd.f32 %v1025_v28, %v497_v38 }
 0x27f   :  { %891 = vst [vmem:[#allocation8] sm:$0xff] %v882_v45  ;;  %v885_v51 = vmax.f32 %v876_v46, 0.0 }
 0x280   :  { %892 = vst [vmem:[#allocation8 + $0x8] sm:$0xff] %v883_v47  ;;  %v884_v53 = vmax.f32 %v875_v48, 0.0  ;;  %v886_v54 = vmax.f32 %v877_v49, 0.0  ;;  %v878_v55 = vadd.f32 %v869_v34, %v846_v50  ;;  %v801_v56 = vpop.f32.mrb[8].mxu0  ;;  %v1026_v57 = vpop.f32.mrb[8].mxu1 }
 0x281   :  { %894 = vst [vmem:[#allocation8 + $0x18] sm:$0xff] %v885_v51  ;;  %v802_v59 = vadd.f32 %v801_v56, %v498_v52  ;;  %v803_v60 = vpop.f32.mrb[9].mxu0  ;;  %v1027_v61 = vpop.f32.mrb[9].mxu1 }
 0x282   :  { %893 = vst [vmem:[#allocation8 + $0x10] sm:$0xff] %v884_v53  ;;  %895 = vst [vmem:[#allocation8 + $0x20] sm:$0xff] %v886_v54  ;;  %v887_v63 = vmax.f32 %v878_v55, 0.0  ;;  %v804_v0 = vadd.f32 %v803_v60, %v499_v58  ;;  %v1028_v1 = vadd.f32 %v1027_v61, %v1026_v57  ;;  %v805_v2 = vpop.f32.mrb[10].mxu0  ;;  %v1029_v3 = vpop.f32.mrb[10].mxu1 }
 0x283   :  { %v879_v4 = vadd.f32 %v861_v20, %v802_v59  ;;  %v806_v5 = vpop.f32.mrb[11].mxu0  ;;  %v1030_v6 = vpop.f32.mrb[11].mxu1 }
 0x284   :  { %896 = vst [vmem:[#allocation8 + $0x28] sm:$0xff] %v887_v63  ;;  %v880_v7 = vadd.f32 %v865_v24, %v804_v0  ;;  %v851_v8 = vadd.f32 %v1028_v1, %v500_v62 }
 0x285   :  { %v888_v9 = vmax.f32 %v879_v4, 0.0 }
 0x286   :  { %v889_v11 = vmax.f32 %v880_v7, 0.0  ;;  %v881_v12 = vadd.f32 %v869_v34, %v851_v8 }
 0x287   :  { %897 = vst [vmem:[#allocation8 + $0x30] sm:$0xff] %v888_v9 }
 0x288   :  { %898 = vst [vmem:[#allocation8 + $0x38] sm:$0xff] %v889_v11  ;;  %v890_v10 = vmax.f32 %v881_v12, 0.0 }
 0x28a   :  { %899 = vst [vmem:[#allocation8 + $0x40] sm:$0xff] %v890_v10 }
 0x28b   :  { %1242 = shalt.err (!%p1239_p0)
}
 0x28c   :  { %s1243_s28 = scalar_lea.hbm %s1434_s10, 1152 }
 0x28d   :  { %p1244_p1 = scmp.ne.s32.totalorder %s1434_s10, %s1243_s28  ;;  %p1247_p2 = scmp.lt.u32.totalorder %s1243_s28, %s1434_s10 }
 0x28f   :  { %p1249_p3 = pnand %p1247_p2, %p1244_p1 }
 0x291   :  { %1252 = shalt.err (!%p1249_p3)
}
 0x292   :  { %s1268_s25 = smov 384   ;;  %s1269_s26 = smov 24  }
 0x293   :  { %911 = dma.vmem_to_hbm [thread:$0]  %s906_s9, 1152, %s1434_s10, [#allocation4], %s1268_s25, %s1268_s25, %s1269_s26  }
 0x294   :  { %1257 = dma.done.wait [#allocation4], 1152  }
 0x295   :  { %1258 = vsyncadd [#allocation4], 4294966144 }
 0x296   :  { %915 = vsyncpa [#allocation3], 1 }
 0x297   :  { %916 = vsyncpa [#allocation6], 1 }
 0x298   :  { %917 = vsyncpa [#allocation4], 1 }

</bundles_post_ra>
